<compile_context>
chip_gen: v7x
topology: tpu7x:2x2x1
jax: 0.10.0
libtpu: 0.0.40
codegen_flags: <defaults>
</compile_context>

<pallas_src>
import functools

import numpy as np
import jax
import jax.numpy as jnp
from jax.experimental import pallas as pl
from jax.experimental.pallas import tpu as pltpu


def _conv_block_kernel(x_ref, w_ref, b_ref, m_ref, o_ref, *,
                       H, W, KH, KW, Cin, Cout, padding,
                       negative_slope, use_act, stacked):
    # x_ref: (1, Cin, H*W)   lane-dense image slab
    # w_ref: (Cout, KH*KW*Cin) if stacked else (KH*KW, Cout, Cin)
    # b_ref: (Cout, 1)
    # m_ref: (KH*KW, 1, H*W) per-tap validity masks (zero padding)
    # o_ref: (1, Cout, H*W)  lane-dense output slab
    HW = H * W
    x = x_ref[0]                                   # (Cin, HW)

    # Shifted (and zero-padded) view of the image for every tap.
    pieces = []
    for kh in range(KH):
        dh = kh - padding
        for kw in range(KW):
            dw = kw - padding
            t = kh * KW + kw
            s = dh * W + dw                        # flat shift for this tap
            if s == 0:
                xs = x                             # center tap: mask is all-ones
            else:
                xs = pltpu.roll(x, (-s) % HW, 1)   # xs[:, j] = x[:, (j + s) % HW]
                xs = xs * m_ref[t]                 # (1, HW) mask kills OOB taps
            pieces.append(xs)

    if stacked:
        # Single fat MXU matmul: contraction dim K = KH*KW*Cin, N = HW lanes.
        x_stack = jnp.concatenate(pieces, axis=0)              # (K, HW)
        acc = jnp.dot(w_ref[...], x_stack,
                      preferred_element_type=jnp.float32)      # (Cout, HW)
        acc = acc + b_ref[...]                                 # (Cout, 1) bcast
    else:
        # Per-tap accumulation (Cin not sublane aligned); output stays
        # lane-dense so each MXU push still does N = HW useful columns.
        acc = jnp.broadcast_to(b_ref[...], (Cout, HW)).astype(jnp.float32)
        for t, xs in enumerate(pieces):
            acc = acc + jnp.dot(w_ref[t], xs,
                                preferred_element_type=jnp.float32)

    if use_act:
        acc = jnp.maximum(acc, negative_slope * acc)           # LeakyReLU(0.2)
    o_ref[0] = acc.astype(o_ref.dtype)


def conv_block(x_nchw, weight_oihw, bias, *, use_act=True, padding=1,
               negative_slope=0.2):
    """ConvBlock forward: Conv2d(kernel KHxKW, stride=1, padding) + LeakyReLU(0.2).

    x_nchw:      (N, Cin, H, W) float32
    weight_oihw: (Cout, Cin, KH, KW)  (PyTorch OIHW layout)
    bias:        (Cout,)
    returns      (N, Cout, H, W)
    """
    N, Cin, H, W = x_nchw.shape
    Cout, Cin_w, KH, KW = weight_oihw.shape
    assert Cin_w == Cin, (Cin_w, Cin)
    if 2 * padding != KH - 1 or 2 * padding != KW - 1:
        # Guard (review correctness concern): the lane-roll formulation needs
        # stride=1 'same' output size, i.e. 2*padding == kernel_size - 1.
        raise NotImplementedError(
            "conv_block supports stride=1 'same' convs "
            "(2*padding == kernel_size - 1) only")

    HW = H * W
    K = KH * KW * Cin
    stacked = (Cin % 8 == 0)   # sublane-aligned pieces -> single fat matmul

    # Free reshapes only -- no transpose/pad HBM passes in the wrapper.
    x_flat = x_nchw.reshape(N, Cin, HW)
    b2 = bias.reshape(Cout, 1)

    if stacked:
        # (Cout, KH, KW, Cin) -> (Cout, K): tap-major / cin-minor row order,
        # matching the in-kernel concatenation order.
        w_arg = jnp.transpose(weight_oihw, (0, 2, 3, 1)).reshape(Cout, K)
        w_spec = pl.BlockSpec((Cout, K), lambda n: (0, 0))
    else:
        # (KH*KW, Cout, Cin): one aligned (Cout, Cin) tile per tap.
        w_arg = jnp.transpose(weight_oihw, (2, 3, 0, 1)).reshape(KH * KW, Cout, Cin)
        w_spec = pl.BlockSpec((KH * KW, Cout, Cin), lambda n: (0, 0, 0))

    # Per-tap {0,1} boundary masks (implement the zero padding in-VMEM).
    # Built with numpy at trace time -> tiny compile-time constant input.
    hh = np.repeat(np.arange(H), W)
    ww = np.tile(np.arange(W), H)
    masks = []
    for kh in range(KH):
        for kw in range(KW):
            dh, dw = kh - padding, kw - padding
            m = ((hh + dh >= 0) & (hh + dh < H) &
                 (ww + dw >= 0) & (ww + dw < W))
            masks.append(m.astype(np.float32))
    tap_mask = jnp.asarray(np.stack(masks, 0).reshape(KH * KW, 1, HW))

    kernel = functools.partial(
        _conv_block_kernel, H=H, W=W, KH=KH, KW=KW, Cin=Cin, Cout=Cout,
        padding=padding, negative_slope=negative_slope, use_act=use_act,
        stacked=stacked)

    # Explicit, generation-aware VMEM budget (tiny at these shapes; capped
    # below v7x's 64 MiB physical VMEM).
    work_bytes = 4 * HW * (2 * (Cin + Cout) + 3 * K) + 4 * Cout * (K + 1)
    vmem_limit = int(max(16 << 20, min(2 * work_bytes + (4 << 20), 48 << 20)))

    out_flat = pl.pallas_call(
        kernel,
        out_shape=jax.ShapeDtypeStruct((N, Cout, HW), x_nchw.dtype),
        grid_spec=pltpu.PrefetchScalarGridSpec(
            num_scalar_prefetch=0,
            grid=(N,),
            in_specs=[
                pl.BlockSpec((1, Cin, HW), lambda n: (n, 0, 0)),
                w_spec,
                pl.BlockSpec((Cout, 1), lambda n: (0, 0)),
                pl.BlockSpec((KH * KW, 1, HW), lambda n: (0, 0, 0)),
            ],
            out_specs=pl.BlockSpec((1, Cout, HW), lambda n: (n, 0, 0)),
        ),
        compiler_params=pltpu.CompilerParams(
            dimension_semantics=("parallel",),
            vmem_limit_bytes=vmem_limit),
    )(x_flat, w_arg, b2, tap_mask)

    return out_flat.reshape(N, Cout, H, W)


def conv_block_reference(x_nchw, weight_oihw, bias, *, use_act=True, padding=1,
                         negative_slope=0.2):
    out = jax.lax.conv_general_dilated(
        x_nchw, weight_oihw,
        window_strides=(1, 1),
        padding=((padding, padding), (padding, padding)),
        dimension_numbers=("NCHW", "OIHW", "NCHW"))
    out = out + bias.reshape(1, -1, 1, 1)
    if use_act:
        out = jnp.where(out >= 0, out, negative_slope * out)
    return out


if __name__ == "__main__":
    key = jax.random.PRNGKey(0)
    kx, kw, kb, kx2, kw2, kb2 = jax.random.split(key, 6)

    KH = KW = 3

    # Case 1: Cin = 4 (not sublane aligned) -> per-tap accumulation path.
    N, Cin, Cout, H, W = 2, 4, 8, 16, 16
    x = jax.random.normal(kx, (N, Cin, H, W), dtype=jnp.float32)
    weight = jax.random.normal(kw, (Cout, Cin, KH, KW), dtype=jnp.float32) * 0.1
    bias = jax.random.normal(kb, (Cout,), dtype=jnp.float32) * 0.1

    out = jax.block_until_ready(conv_block(x, weight, bias, use_act=True))
    ref = conv_block_reference(x, weight, bias, use_act=True)
    assert out.shape == (N, Cout, H, W), out.shape
    assert jnp.allclose(out, ref, atol=1e-4, rtol=1e-4), float(
        jnp.max(jnp.abs(out - ref)))

    # Case 2: Cin = 8 (sublane aligned) -> single stacked im2col-style matmul.
    N2, Cin2, Cout2 = 2, 8, 8
    x2 = jax.random.normal(kx2, (N2, Cin2, H, W), dtype=jnp.float32)
    weight2 = jax.random.normal(kw2, (Cout2, Cin2, KH, KW), dtype=jnp.float32) * 0.1
    bias2 = jax.random.normal(kb2, (Cout2,), dtype=jnp.float32) * 0.1

    out2 = jax.block_until_ready(conv_block(x2, weight2, bias2, use_act=True))
    ref2 = conv_block_reference(x2, weight2, bias2, use_act=True)
    assert out2.shape == (N2, Cout2, H, W), out2.shape
    assert jnp.allclose(out2, ref2, atol=1e-4, rtol=1e-4), float(
        jnp.max(jnp.abs(out2 - ref2)))

    print("KERNEL_OK")
</pallas_src>

<mosaic_0001>
module attributes {stable_mosaic.version = 11 : i64} {
  func.func @_conv_block_kernel(%arg0: i32, %arg1: memref<1x4x256xf32, #tpu.memory_space<vmem>>, %arg2: memref<9x8x4xf32, #tpu.memory_space<vmem>>, %arg3: memref<8x1xf32, #tpu.memory_space<vmem>>, %arg4: memref<9x1x256xf32, #tpu.memory_space<vmem>>, %arg5: memref<1x8x256xf32, #tpu.memory_space<vmem>>) attributes {dimension_semantics = [#tpu.dimension_semantics<parallel>], iteration_bounds = array<i64: 2>, scalar_prefetch = 0 : i64, scratch_operands = 0 : i64, tpu.core_type = #tpu.core_type<tc>, window_params = [{transform_indices = @transform_0, window_bounds = array<i64: 1, 4, 256>}, {pipeline_mode = #tpu.pipeline_mode<synchronous>, transform_indices = @transform_1, window_bounds = array<i64: 9, 8, 4>}, {pipeline_mode = #tpu.pipeline_mode<synchronous>, transform_indices = @transform_2, window_bounds = array<i64: 8, 1>}, {pipeline_mode = #tpu.pipeline_mode<synchronous>, transform_indices = @transform_3, window_bounds = array<i64: 9, 1, 256>}, {transform_indices = @transform_4, window_bounds = array<i64: 1, 8, 256>}]} {
    %c0 = arith.constant 0 : index
    %c0_0 = arith.constant 0 : index
    %c0_1 = arith.constant 0 : index
    %0 = vector.load %arg1[%c0, %c0_0, %c0_1] : memref<1x4x256xf32, #tpu.memory_space<vmem>>, vector<1x4x256xf32>
    %1 = vector.shape_cast %0 : vector<1x4x256xf32> to vector<4x256xf32>
    %c17_i32 = arith.constant 17 : i32
    %2 = tpu.dynamic_rotate %1 by %c17_i32 dim 1 : vector<4x256xf32>, i32 -> vector<4x256xf32>
    %c0_2 = arith.constant 0 : index
    %c0_3 = arith.constant 0 : index
    %c0_4 = arith.constant 0 : index
    %3 = vector.load %arg4[%c0_2, %c0_3, %c0_4] : memref<9x1x256xf32, #tpu.memory_space<vmem>>, vector<1x1x256xf32>
    %4 = vector.shape_cast %3 : vector<1x1x256xf32> to vector<1x256xf32>
    %5 = vector.broadcast %4 : vector<1x256xf32> to vector<4x256xf32>
    %6 = arith.mulf %2, %5 : vector<4x256xf32>
    %c16_i32 = arith.constant 16 : i32
    %7 = tpu.dynamic_rotate %1 by %c16_i32 dim 1 : vector<4x256xf32>, i32 -> vector<4x256xf32>
    %c1 = arith.constant 1 : index
    %c0_5 = arith.constant 0 : index
    %c0_6 = arith.constant 0 : index
    %8 = vector.load %arg4[%c1, %c0_5, %c0_6] : memref<9x1x256xf32, #tpu.memory_space<vmem>>, vector<1x1x256xf32>
    %9 = vector.shape_cast %8 : vector<1x1x256xf32> to vector<1x256xf32>
    %10 = vector.broadcast %9 : vector<1x256xf32> to vector<4x256xf32>
    %11 = arith.mulf %7, %10 : vector<4x256xf32>
    %c15_i32 = arith.constant 15 : i32
    %12 = tpu.dynamic_rotate %1 by %c15_i32 dim 1 : vector<4x256xf32>, i32 -> vector<4x256xf32>
    %c2 = arith.constant 2 : index
    %c0_7 = arith.constant 0 : index
    %c0_8 = arith.constant 0 : index
    %13 = vector.load %arg4[%c2, %c0_7, %c0_8] : memref<9x1x256xf32, #tpu.memory_space<vmem>>, vector<1x1x256xf32>
    %14 = vector.shape_cast %13 : vector<1x1x256xf32> to vector<1x256xf32>
    %15 = vector.broadcast %14 : vector<1x256xf32> to vector<4x256xf32>
    %16 = arith.mulf %12, %15 : vector<4x256xf32>
    %c1_i32 = arith.constant 1 : i32
    %17 = tpu.dynamic_rotate %1 by %c1_i32 dim 1 : vector<4x256xf32>, i32 -> vector<4x256xf32>
    %c3 = arith.constant 3 : index
    %c0_9 = arith.constant 0 : index
    %c0_10 = arith.constant 0 : index
    %18 = vector.load %arg4[%c3, %c0_9, %c0_10] : memref<9x1x256xf32, #tpu.memory_space<vmem>>, vector<1x1x256xf32>
    %19 = vector.shape_cast %18 : vector<1x1x256xf32> to vector<1x256xf32>
    %20 = vector.broadcast %19 : vector<1x256xf32> to vector<4x256xf32>
    %21 = arith.mulf %17, %20 : vector<4x256xf32>
    %c255_i32 = arith.constant 255 : i32
    %22 = tpu.dynamic_rotate %1 by %c255_i32 dim 1 : vector<4x256xf32>, i32 -> vector<4x256xf32>
    %c5 = arith.constant 5 : index
    %c0_11 = arith.constant 0 : index
    %c0_12 = arith.constant 0 : index
    %23 = vector.load %arg4[%c5, %c0_11, %c0_12] : memref<9x1x256xf32, #tpu.memory_space<vmem>>, vector<1x1x256xf32>
    %24 = vector.shape_cast %23 : vector<1x1x256xf32> to vector<1x256xf32>
    %25 = vector.broadcast %24 : vector<1x256xf32> to vector<4x256xf32>
    %26 = arith.mulf %22, %25 : vector<4x256xf32>
    %c241_i32 = arith.constant 241 : i32
    %27 = tpu.dynamic_rotate %1 by %c241_i32 dim 1 : vector<4x256xf32>, i32 -> vector<4x256xf32>
    %c6 = arith.constant 6 : index
    %c0_13 = arith.constant 0 : index
    %c0_14 = arith.constant 0 : index
    %28 = vector.load %arg4[%c6, %c0_13, %c0_14] : memref<9x1x256xf32, #tpu.memory_space<vmem>>, vector<1x1x256xf32>
    %29 = vector.shape_cast %28 : vector<1x1x256xf32> to vector<1x256xf32>
    %30 = vector.broadcast %29 : vector<1x256xf32> to vector<4x256xf32>
    %31 = arith.mulf %27, %30 : vector<4x256xf32>
    %c240_i32 = arith.constant 240 : i32
    %32 = tpu.dynamic_rotate %1 by %c240_i32 dim 1 : vector<4x256xf32>, i32 -> vector<4x256xf32>
    %c7 = arith.constant 7 : index
    %c0_15 = arith.constant 0 : index
    %c0_16 = arith.constant 0 : index
    %33 = vector.load %arg4[%c7, %c0_15, %c0_16] : memref<9x1x256xf32, #tpu.memory_space<vmem>>, vector<1x1x256xf32>
    %34 = vector.shape_cast %33 : vector<1x1x256xf32> to vector<1x256xf32>
    %35 = vector.broadcast %34 : vector<1x256xf32> to vector<4x256xf32>
    %36 = arith.mulf %32, %35 : vector<4x256xf32>
    %c239_i32 = arith.constant 239 : i32
    %37 = tpu.dynamic_rotate %1 by %c239_i32 dim 1 : vector<4x256xf32>, i32 -> vector<4x256xf32>
    %c8 = arith.constant 8 : index
    %c0_17 = arith.constant 0 : index
    %c0_18 = arith.constant 0 : index
    %38 = vector.load %arg4[%c8, %c0_17, %c0_18] : memref<9x1x256xf32, #tpu.memory_space<vmem>>, vector<1x1x256xf32>
    %39 = vector.shape_cast %38 : vector<1x1x256xf32> to vector<1x256xf32>
    %40 = vector.broadcast %39 : vector<1x256xf32> to vector<4x256xf32>
    %41 = arith.mulf %37, %40 : vector<4x256xf32>
    %c0_19 = arith.constant 0 : index
    %c0_20 = arith.constant 0 : index
    %42 = vector.load %arg3[%c0_19, %c0_20] : memref<8x1xf32, #tpu.memory_space<vmem>>, vector<8x1xf32>
    %43 = vector.shape_cast %42 : vector<8x1xf32> to vector<8x1xf32>
    %44 = vector.broadcast %43 : vector<8x1xf32> to vector<8x256xf32>
    %c0_21 = arith.constant 0 : index
    %c0_22 = arith.constant 0 : index
    %c0_23 = arith.constant 0 : index
    %45 = vector.load %arg2[%c0_21, %c0_22, %c0_23] : memref<9x8x4xf32, #tpu.memory_space<vmem>>, vector<1x8x4xf32>
    %46 = vector.shape_cast %45 : vector<1x8x4xf32> to vector<8x4xf32>
    %cst = arith.constant dense<0.000000e+00> : vector<8x256xf32>
    %47 = tpu.matmul %46, %6, %cst {dimension_numbers = #tpu.dot_dimension_numbers<[1], [0], [0], [1], [0, 0, 1, 1], [], []>} : vector<8x4xf32>, vector<4x256xf32>, vector<8x256xf32> -> vector<8x256xf32>
    %48 = arith.addf %44, %47 : vector<8x256xf32>
    %c1_24 = arith.constant 1 : index
    %c0_25 = arith.constant 0 : index
    %c0_26 = arith.constant 0 : index
    %49 = vector.load %arg2[%c1_24, %c0_25, %c0_26] : memref<9x8x4xf32, #tpu.memory_space<vmem>>, vector<1x8x4xf32>
    %50 = vector.shape_cast %49 : vector<1x8x4xf32> to vector<8x4xf32>
    %cst_27 = arith.constant dense<0.000000e+00> : vector<8x256xf32>
    %51 = tpu.matmul %50, %11, %cst_27 {dimension_numbers = #tpu.dot_dimension_numbers<[1], [0], [0], [1], [0, 0, 1, 1], [], []>} : vector<8x4xf32>, vector<4x256xf32>, vector<8x256xf32> -> vector<8x256xf32>
    %52 = arith.addf %48, %51 : vector<8x256xf32>
    %c2_28 = arith.constant 2 : index
    %c0_29 = arith.constant 0 : index
    %c0_30 = arith.constant 0 : index
    %53 = vector.load %arg2[%c2_28, %c0_29, %c0_30] : memref<9x8x4xf32, #tpu.memory_space<vmem>>, vector<1x8x4xf32>
    %54 = vector.shape_cast %53 : vector<1x8x4xf32> to vector<8x4xf32>
    %cst_31 = arith.constant dense<0.000000e+00> : vector<8x256xf32>
    %55 = tpu.matmul %54, %16, %cst_31 {dimension_numbers = #tpu.dot_dimension_numbers<[1], [0], [0], [1], [0, 0, 1, 1], [], []>} : vector<8x4xf32>, vector<4x256xf32>, vector<8x256xf32> -> vector<8x256xf32>
    %56 = arith.addf %52, %55 : vector<8x256xf32>
    %c3_32 = arith.constant 3 : index
    %c0_33 = arith.constant 0 : index
    %c0_34 = arith.constant 0 : index
    %57 = vector.load %arg2[%c3_32, %c0_33, %c0_34] : memref<9x8x4xf32, #tpu.memory_space<vmem>>, vector<1x8x4xf32>
    %58 = vector.shape_cast %57 : vector<1x8x4xf32> to vector<8x4xf32>
    %cst_35 = arith.constant dense<0.000000e+00> : vector<8x256xf32>
    %59 = tpu.matmul %58, %21, %cst_35 {dimension_numbers = #tpu.dot_dimension_numbers<[1], [0], [0], [1], [0, 0, 1, 1], [], []>} : vector<8x4xf32>, vector<4x256xf32>, vector<8x256xf32> -> vector<8x256xf32>
    %60 = arith.addf %56, %59 : vector<8x256xf32>
    %c4 = arith.constant 4 : index
    %c0_36 = arith.constant 0 : index
    %c0_37 = arith.constant 0 : index
    %61 = vector.load %arg2[%c4, %c0_36, %c0_37] : memref<9x8x4xf32, #tpu.memory_space<vmem>>, vector<1x8x4xf32>
    %62 = vector.shape_cast %61 : vector<1x8x4xf32> to vector<8x4xf32>
    %cst_38 = arith.constant dense<0.000000e+00> : vector<8x256xf32>
    %63 = tpu.matmul %62, %1, %cst_38 {dimension_numbers = #tpu.dot_dimension_numbers<[1], [0], [0], [1], [0, 0, 1, 1], [], []>} : vector<8x4xf32>, vector<4x256xf32>, vector<8x256xf32> -> vector<8x256xf32>
    %64 = arith.addf %60, %63 : vector<8x256xf32>
    %c5_39 = arith.constant 5 : index
    %c0_40 = arith.constant 0 : index
    %c0_41 = arith.constant 0 : index
    %65 = vector.load %arg2[%c5_39, %c0_40, %c0_41] : memref<9x8x4xf32, #tpu.memory_space<vmem>>, vector<1x8x4xf32>
    %66 = vector.shape_cast %65 : vector<1x8x4xf32> to vector<8x4xf32>
    %cst_42 = arith.constant dense<0.000000e+00> : vector<8x256xf32>
    %67 = tpu.matmul %66, %26, %cst_42 {dimension_numbers = #tpu.dot_dimension_numbers<[1], [0], [0], [1], [0, 0, 1, 1], [], []>} : vector<8x4xf32>, vector<4x256xf32>, vector<8x256xf32> -> vector<8x256xf32>
    %68 = arith.addf %64, %67 : vector<8x256xf32>
    %c6_43 = arith.constant 6 : index
    %c0_44 = arith.constant 0 : index
    %c0_45 = arith.constant 0 : index
    %69 = vector.load %arg2[%c6_43, %c0_44, %c0_45] : memref<9x8x4xf32, #tpu.memory_space<vmem>>, vector<1x8x4xf32>
    %70 = vector.shape_cast %69 : vector<1x8x4xf32> to vector<8x4xf32>
    %cst_46 = arith.constant dense<0.000000e+00> : vector<8x256xf32>
    %71 = tpu.matmul %70, %31, %cst_46 {dimension_numbers = #tpu.dot_dimension_numbers<[1], [0], [0], [1], [0, 0, 1, 1], [], []>} : vector<8x4xf32>, vector<4x256xf32>, vector<8x256xf32> -> vector<8x256xf32>
    %72 = arith.addf %68, %71 : vector<8x256xf32>
    %c7_47 = arith.constant 7 : index
    %c0_48 = arith.constant 0 : index
    %c0_49 = arith.constant 0 : index
    %73 = vector.load %arg2[%c7_47, %c0_48, %c0_49] : memref<9x8x4xf32, #tpu.memory_space<vmem>>, vector<1x8x4xf32>
    %74 = vector.shape_cast %73 : vector<1x8x4xf32> to vector<8x4xf32>
    %cst_50 = arith.constant dense<0.000000e+00> : vector<8x256xf32>
    %75 = tpu.matmul %74, %36, %cst_50 {dimension_numbers = #tpu.dot_dimension_numbers<[1], [0], [0], [1], [0, 0, 1, 1], [], []>} : vector<8x4xf32>, vector<4x256xf32>, vector<8x256xf32> -> vector<8x256xf32>
    %76 = arith.addf %72, %75 : vector<8x256xf32>
    %c8_51 = arith.constant 8 : index
    %c0_52 = arith.constant 0 : index
    %c0_53 = arith.constant 0 : index
    %77 = vector.load %arg2[%c8_51, %c0_52, %c0_53] : memref<9x8x4xf32, #tpu.memory_space<vmem>>, vector<1x8x4xf32>
    %78 = vector.shape_cast %77 : vector<1x8x4xf32> to vector<8x4xf32>
    %cst_54 = arith.constant dense<0.000000e+00> : vector<8x256xf32>
    %79 = tpu.matmul %78, %41, %cst_54 {dimension_numbers = #tpu.dot_dimension_numbers<[1], [0], [0], [1], [0, 0, 1, 1], [], []>} : vector<8x4xf32>, vector<4x256xf32>, vector<8x256xf32> -> vector<8x256xf32>
    %80 = arith.addf %76, %79 : vector<8x256xf32>
    %cst_55 = arith.constant 2.000000e-01 : f32
    %81 = vector.broadcast %cst_55 : f32 to vector<8x256xf32>
    %82 = arith.mulf %81, %80 : vector<8x256xf32>
    %83 = arith.maximumf %80, %82 : vector<8x256xf32>
    %c0_56 = arith.constant 0 : index
    %c0_57 = arith.constant 0 : index
    %c0_58 = arith.constant 0 : index
    %84 = vector.load %arg5[%c0_56, %c0_57, %c0_58] : memref<1x8x256xf32, #tpu.memory_space<vmem>>, vector<1x8x256xf32>
    %85 = vector.shape_cast %84 : vector<1x8x256xf32> to vector<8x256xf32>
    %86 = vector.shape_cast %83 : vector<8x256xf32> to vector<1x8x256xf32>
    tpu.vector_store %arg5[%c0_56, %c0_57, %c0_58], %86 {strides = array<i32>} : memref<1x8x256xf32, #tpu.memory_space<vmem>>, vector<1x8x256xf32>,
    return
  }
  func.func @transform_0(%arg0: i32) -> (i32, i32, i32) {
    %c0_i32 = arith.constant 0 : i32
    %c0_i32_0 = arith.constant 0 : i32
    %c0_i32_1 = arith.constant 0 : i32
    return %arg0, %c0_i32, %c0_i32_0 : i32, i32, i32
  }
  func.func @transform_1(%arg0: i32) -> (i32, i32, i32) {
    %c0_i32 = arith.constant 0 : i32
    %c0_i32_0 = arith.constant 0 : i32
    %c0_i32_1 = arith.constant 0 : i32
    %c0_i32_2 = arith.constant 0 : i32
    return %c0_i32, %c0_i32_0, %c0_i32_1 : i32, i32, i32
  }
  func.func @transform_2(%arg0: i32) -> (i32, i32) {
    %c0_i32 = arith.constant 0 : i32
    %c0_i32_0 = arith.constant 0 : i32
    %c0_i32_1 = arith.constant 0 : i32
    return %c0_i32, %c0_i32_0 : i32, i32
  }
  func.func @transform_3(%arg0: i32) -> (i32, i32, i32) {
    %c0_i32 = arith.constant 0 : i32
    %c0_i32_0 = arith.constant 0 : i32
    %c0_i32_1 = arith.constant 0 : i32
    %c0_i32_2 = arith.constant 0 : i32
    return %c0_i32, %c0_i32_0, %c0_i32_1 : i32, i32, i32
  }
  func.func @transform_4(%arg0: i32) -> (i32, i32, i32) {
    %c0_i32 = arith.constant 0 : i32
    %c0_i32_0 = arith.constant 0 : i32
    %c0_i32_1 = arith.constant 0 : i32
    return %arg0, %c0_i32, %c0_i32_0 : i32, i32, i32
  }
}

</mosaic_0001>

<bundles_post_ra>
// kernel: tpu_custom_call.1
= control target key start
LH: loop header
LB: loop body
LE: loop exit
PB: predicated region body
PF: predicated region fallthrough
CT: control target
= control target key end

     0   :  { %9 = vsyncpa [#allocation3], 0  ;;  %s1667_s0 = inlined_call_operand.vmem [shape: f32[2,4,256], index: 0, kind: input, shape index: {}]   ;;  %s1668_s1 = inlined_call_operand.vmem [shape: f32[9,8,4], index: 1, kind: input, shape index: {}]   ;;  %s1669_s2 = inlined_call_operand.vmem [shape: f32[8,1], index: 2, kind: input, shape index: {}]   ;;  %s1670_s3 = inlined_call_operand.vmem [shape: f32[9,1,256], index: 3, kind: input, shape index: {}]   ;;  %s1671_s4 = inlined_call_operand.hbm [shape: f32[2,8,256], index: 4, kind: output, shape index: {}]  }
   0x1   :  { %11 = vsyncpa [#allocation3 + $0x1], 0  ;;  %s1443_s15 = smov 0   ;;  %s1445_s16 = smov 0  }
   0x2   :  { %s1447_s17 = smov 0   ;;  %s1449_s18 = smov 0  }
   0x3 LB: > { %s1464_s19 = sadd.s32 4294967295, %s1405_s18   ;;  %s1218_s20 = sadd.s32 4294967294, %s1405_s18   ;;  %s1405_s18 = sphi %s1449_s18, %s1677_s18   ;;  %s1401_s17 = sphi %s1447_s17, %s1676_s17   ;;  %s1397_s16 = sphi %s1445_s16, %s1675_s16   ;;  %s1393_s15 = sphi %s1443_s15, %s1674_s15  }
   0x4   : > { %s1468_s21 = sadd.s32 1, %s1405_s18   ;;  %s113_s22 = sadd.s32 1, %s1401_s17 }
   0x5   : > { %s110_s23 = ssub.s32 %s1405_s18, %s1468_s21  ;;  %p123_p0 = scmp.ne.s32.totalorder %s1401_s17, %s1397_s16 }
   0x6   : > { %p111_p1 = scmp.eq.s32.totalorder %s110_s23, 0  ;;  %p124_p2 = scmp.eq.s32.totalorder %s1464_s19, 1 }
   0x7   : > { %p129_p3 = scmp.ne.s32.totalorder %s1397_s16, %s1393_s15  ;;  %p130_p4 = scmp.eq.s32.totalorder %s1218_s20, 1 }
   0x8   : > { %s1479_s24 = scalar_select %p111_p1, %s1401_s17, %s113_s22  }
   0x9   : > { %p1481_p5 = por %p124_p2, %p123_p0  ;;  %p1485_p6 = por %p130_p4, %p129_p3 }
   0xa   : > { %p1221_p7 = scmp.ge.s32.totalorder %s1405_s18, 1  ;;  %p165_p8 = scmp.lt.s32.totalorder %s1405_s18, 3 }
   0xc   : > { %p166_p9 = pnand %p1221_p7, %p165_p8 }
   0xd   : > { %p191_p10 = scmp.lt.s32.totalorder (!%p166_p9), %s1464_s19, 1  ;;  %v1407_v0 = vmov (!%p166_p9), 0.0   ;;  %vm388_vm0 = vcmask (!%p166_p9), 1043456   ;;  %s1408_s6 = smov (!%p166_p9), 127   ;;  %vm384_vm1 = vcmask (!%p166_p9), 31744   ;;  %v1247_v3 = vld [vmem:[%s1668_s1 + $0x20] sm:$0xff] (!%p166_p9)  ;;  %v204_v6 = vlaneseq (!%p166_p9) }
   0xe   : > { %169 = sbr.rel (%p166_p9) target bundleno = 409 (0x199), region = 36  ;;  %793 = vmatprep.mubr.f32.mxu0 (!%p166_p9), %v1407_v0  ;;  %459 = vmatprep.mubr.f32.mxu1 (!%p166_p9), %v1407_v0  ;;  %s1409_s7 = smov (!%p166_p9), 17   ;;  %v1414_v4 = vmov (!%p166_p9), 0   ;;  %v377_v5 = vld [vmem:[%s1669_s2] sm:$0xff] (!%p166_p9)  ;;  %v1228_v11 = vld [vmem:[%s1670_s3 + $0xa] sm:$0x3] (!%p166_p9) }
   0xf   : > { %s1410_s10 = smov (!%p166_p9), 16   ;;  %s1411_s11 = smov (!%p166_p9), 113   ;;  %1341 = vset.pattern.permute.xlu0 (!%p166_p9), %v1414_v4  ;;  %v212_v7 = vshrl.u32 (!%p166_p9), %v204_v6, 7  ;;  %v1508_v8 = vand.u32 (!%p166_p9), 127, %v204_v6  ;;  %v209_v12 = vld [vmem:[%s1670_s3] sm:$0x3] (!%p166_p9) }
  0x10   : > { %s1412_s12 = smov (!%p166_p9), 15   ;;  %s1413_s13 = smov (!%p166_p9), 112   ;;  %v1225_v15 = vld [vmem:[%s1670_s3 + $0x2] sm:$0x3] (!%p166_p9)  ;;  %v1229_v32 = vld [vmem:[%s1670_s3 + $0xc] sm:$0x3] (!%p166_p9) }
  0x11   : > { %s1415_s14 = smov (!%p166_p9), 1   ;;  %s1416_s20 = smov (!%p166_p9), 111   ;;  %v1510_v9 = vsub.s32 (!%p166_p9), 0, %v212_v7  ;;  %v1512_v10 = vsub.s32 (!%p166_p9), 1, %v212_v7  ;;  %vm293_vm2 = vcmp.lt.s32.totalorder (!%p166_p9), %v1508_v8, 127  ;;  %vm206_vm3 = vcmp.lt.s32.totalorder (!%p166_p9), %v1508_v8, 17 }
  0x12   : > { %vm227_vm4 = vcmp.lt.s32.totalorder (!%p166_p9), %v1508_v8, 16  ;;  %v383_v33 = vld [vmem:[%s1668_s1] sm:$0xff] (!%p166_p9)  ;;  %v1251_v34 = vld [vmem:[%s1668_s1 + $0x28] sm:$0xff] (!%p166_p9)  ;;  %vm315_vm5 = vcmp.lt.s32.totalorder (!%p166_p9), %v1508_v8, 113  ;;  %vm249_vm6 = vcmp.lt.s32.totalorder (!%p166_p9), %v1508_v8, 15  ;;  %v1255_v54 = vld [vmem:[%s1668_s1 + $0x30] sm:$0xff] (!%p166_p9) }
  0x13   : > { %v302_v16 = vrot.slane (!%p166_p9), %v1228_v11, %v1510_v9  ;;  %v306_v17 = vrot.slane (!%p166_p9), %v1228_v11, %v1512_v10  ;;  %v214_v18 = vrot.slane (!%p166_p9), %v209_v12, %v1510_v9  ;;  %v218_v19 = vrot.slane (!%p166_p9), %v209_v12, %v1512_v10  ;;  %v1226_v43 = vld [vmem:[%s1670_s3 + $0x4] sm:$0x3] (!%p166_p9)  ;;  %v1230_v52 = vld [vmem:[%s1670_s3 + $0xe] sm:$0x3] (!%p166_p9)  ;;  %v1227_v63 = vld [vmem:[%s1670_s3 + $0x6] sm:$0x3] (!%p166_p9) }
  0x14   : > { %v236_v22 = vrot.slane (!%p166_p9), %v1225_v15, %v1510_v9  ;;  %v240_v23 = vrot.slane (!%p166_p9), %v1225_v15, %v1512_v10  ;;  %v324_v39 = vrot.slane (!%p166_p9), %v1229_v32, %v1510_v9  ;;  %v328_v42 = vrot.slane (!%p166_p9), %v1229_v32, %v1512_v10  ;;  %v1235_v53 = vld [vmem:[%s1668_s1 + $0x8] sm:$0xff] (!%p166_p9)  ;;  %v1231_v12 = vld [vmem:[%s1670_s3 + $0x10] sm:$0x3] (!%p166_p9)  ;;  %s188_s22 = sand.u32 (!%p166_p9), 1, %s1397_s16  }
  0x15   : > { %s192_s27 = scalar_select %p191_p10, %s1464_s19, 1  ;;  %v258_v50 = vrot.slane %v1226_v43, %v1510_v9  ;;  %v262_v51 = vrot.slane %v1226_v43, %v1512_v10  ;;  %v346_v59 = vrot.slane %v1230_v52, %v1510_v9  ;;  %vm337_vm7 = vcmp.lt.s32.totalorder %v1508_v8, 112 }
  0x16   : > { %v350_v62 = vrot.slane %v1230_v52, %v1512_v10  ;;  %vm271_vm8 = vcmp.lt.s32.totalorder %v1508_v8, 1  ;;  %v280_v7 = vrot.slane %v1227_v63, %v1510_v9  ;;  %v284_v11 = vrot.slane %v1227_v63, %v1512_v10  ;;  %s1222_s23 = sshll.u32 %s188_s22, 4 }
  0x17   : > { %s1272_s28 = sshll.u32 %s192_s27, 3  ;;  %vm359_vm9 = vcmp.lt.s32.totalorder %v1508_v8, 111  ;;  %v1243_v8 = vld [vmem:[%s1668_s1 + $0x18] sm:$0xff]  ;;  %s1273_s27 = sshll.u32 %s1464_s19, 8 }
  0x18   : > { %s195_s5 = scalar_lea.vmem %s1667_s0, %s1272_s28  ;;  %s190_s28 = scalar_lea.vmem [#allocation2], %s1222_s23 }
  0x19   : > { %v196_v1 = vld [vmem:[%s195_s5] sm:$0xff]  ;;  %s1159_s29 = sshll.u32 %s190_s28, 4  ;;  %s1417_s19 = smov [#allocation2]   ;;  %s1627_s29 = int_to_ptr.vmem [resolvable:$true] %s1159_s29 }
  0x1a   : > { %289 = vrot.lane.b32.xlu1 %v196_v1, %s1408_s6  ;;  %200 = vrot.lane.b32.xlu0 %v196_v1, %s1409_s7  ;;  %v198_v2 = vcombine.high %v196_v1, %v196_v1  ;;  %s1343_s8 = scalar_lea.vmem %s1627_s29, 256  ;;  %s1347_s9 = sshll.u32 %s1417_s19, 4  ;;  %s1348_s9 = int_to_ptr.vmem [resolvable:$false] %s1347_s9 }
  0x1b   : > { %p1344_p11 = scmp.ne.s32.totalorder %s1627_s29, %s1343_s8  ;;  %p1350_p0 = scmp.lt.s32.totalorder %s1627_s29, %s1348_s9 }
  0x1c   : > { %1248 = vmatprep.subr.msk.mxu0 %vm388_vm0, %v198_v2 }
  0x1d   : > { %1249 = vmatpush1.msk.msra.mxu0 %vm388_vm0, %v196_v1  ;;  %p1345_p12 = pnand %p1344_p11, %p1481_p5 }
  0x1e   : > { %291 = vrot.lane.b32.xlu1 %v198_v2, %s1408_s6  ;;  %202 = vrot.lane.b32.xlu0 %v198_v2, %s1409_s7  ;;  %s1625_s6 = scalar_lea.hbm %s1671_s4, %s1273_s27  ;;  %s1145_s7 = scalar_lea.sflag [#allocation3], %s188_s22 }
  0x1f   : > { %1250 = vmatmul.mubr.msk.f32.vlgmr.msra.gmra.mrb[0].mxu0 %vm384_vm1, %v1247_v3  ;;  %p1346_p13 = pneg %p1345_p12 }
  0x20   : > { %877 = vmatprep.mubr.f32.mxu0 %v1407_v0 }
  0x22   : > { %225 = vrot.lane.b32.xlu1 %v198_v2, %s1410_s10  ;;  %223 = vrot.lane.b32.xlu0 %v196_v1, %s1410_s10  ;;  %s1349_s10 = scalar_lea.vmem %s1348_s9, 512 }
  0x23   : > { %p1351_p1 = scmp.lt.s32.totalorder %s1349_s10, %s1343_s8 }
  0x25   : > { %p1352_p2 = por %p1351_p1, %p1350_p0 }
  0x26   : > { %313 = vrot.lane.b32.xlu1 %v198_v2, %s1411_s11  ;;  %311 = vrot.lane.b32.xlu0 %v196_v1, %s1411_s11 }
  0x27   : > { %p1353_p3 = pnand %p1352_p2, %p1346_p13 }
  0x2a   : > { %247 = vrot.lane.b32.xlu1 %v198_v2, %s1412_s12  ;;  %245 = vrot.lane.b32.xlu0 %v196_v1, %s1412_s12 }
  0x2e   : > { %335 = vrot.lane.b32.xlu1 %v198_v2, %s1413_s13  ;;  %333 = vrot.lane.b32.xlu0 %v196_v1, %s1413_s13 }
  0x32   : > { %269 = vrot.lane.b32.xlu1 %v198_v2, %s1415_s14  ;;  %267 = vrot.lane.b32.xlu0 %v196_v1, %s1415_s14 }
  0x36   : > { %357 = vrot.lane.b32.xlu1 %v198_v2, %s1416_s20  ;;  %355 = vrot.lane.b32.xlu0 %v196_v1, %s1416_s20 }
  0x3a   : > { %380 = vperm.xlu0 %1341, %v377_v5  }
  0x8c   : > { %v290_v13 = vpop.permute.xlu1 %289  ;;  %v201_v14 = vpop.permute.xlu0 %200 }
  0x90   : > { %v292_v20 = vpop.permute.xlu1 %291  ;;  %v203_v21 = vpop.permute.xlu0 %202 }
  0x91   : > { %v294_v24 = vsel %vm293_vm2, %v290_v13, %v292_v20  ;;  %v295_v25 = vsel %vm293_vm2, %v292_v20, %v290_v13  ;;  %v207_v26 = vsel %vm206_vm3, %v201_v14, %v203_v21  ;;  %v208_v27 = vsel %vm206_vm3, %v203_v21, %v201_v14  ;;  %v1239_v13 = vld [vmem:[%s1668_s1 + $0x10] sm:$0xff]  ;;  %v1259_v14 = vld [vmem:[%s1668_s1 + $0x38] sm:$0xff] }
  0x92   : > { %v309_v28 = vmul.f32 %v302_v16, %v294_v24  ;;  %v310_v29 = vmul.f32 %v306_v17, %v295_v25  ;;  %v221_v30 = vmul.f32 %v214_v18, %v208_v27  ;;  %v222_v31 = vmul.f32 %v218_v19, %v207_v26 }
  0x93   : > { %v368_v19 = vrot.slane %v1231_v12, %v1510_v9 }
  0x94   : > { %v226_v35 = vpop.permute.xlu1 %225  ;;  %1232 = vmatprep.subr.msk.mxu1 %vm388_vm0, %v222_v31  ;;  %v224_v36 = vpop.permute.xlu0 %223  ;;  %1252 = vmatprep.subr.msk.mxu0 %vm388_vm0, %v310_v29 }
  0x95   : > { %v228_v37 = vsel %vm227_vm4, %v224_v36, %v226_v35  ;;  %v229_v38 = vsel %vm227_vm4, %v226_v35, %v224_v36  ;;  %1233 = vmatpush1.msk.msra.mxu1 %vm388_vm0, %v221_v30  ;;  %1253 = vmatpush1.msk.msra.mxu0 %vm388_vm0, %v309_v28 }
  0x96   : > { %v243_v40 = vmul.f32 %v236_v22, %v229_v38  ;;  %v244_v41 = vmul.f32 %v240_v23, %v228_v37  ;;  %1234 = vmatmul.mubr.msk.f32.vlgmr.msra.gmra.mrb[0].mxu1 %vm384_vm1, %v383_v33  ;;  %1254 = vmatmul.mubr.msk.f32.vlgmr.msra.gmra.mrb[0].mxu0 %vm384_vm1, %v1251_v34  ;;  %v372_v22 = vrot.slane %v1231_v12, %v1512_v10  ;;  %v1263_v10 = vld [vmem:[%s1668_s1 + $0x40] sm:$0xff] }
  0x97   : > { %543 = vmatprep.mubr.f32.mxu1 %v1407_v0  ;;  %961 = vmatprep.mubr.f32.mxu0 %v1407_v0 }
  0x98   : > { %v314_v44 = vpop.permute.xlu1 %313  ;;  %1236 = vmatprep.subr.msk.mxu1 %vm388_vm0, %v244_v41  ;;  %v312_v45 = vpop.permute.xlu0 %311 }
  0x99   : > { %v316_v46 = vsel %vm315_vm5, %v312_v45, %v314_v44  ;;  %v317_v47 = vsel %vm315_vm5, %v314_v44, %v312_v45  ;;  %1237 = vmatpush1.msk.msra.mxu1 %vm388_vm0, %v243_v40 }
  0x9a   : > { %v331_v48 = vmul.f32 %v324_v39, %v316_v46  ;;  %v332_v49 = vmul.f32 %v328_v42, %v317_v47 }
  0x9c   : > { %v248_v55 = vpop.permute.xlu1 %247  ;;  %v246_v56 = vpop.permute.xlu0 %245  ;;  %1256 = vmatprep.subr.msk.mxu0 %vm388_vm0, %v332_v49 }
  0x9d   : > { %v250_v57 = vsel %vm249_vm6, %v246_v56, %v248_v55  ;;  %v251_v58 = vsel %vm249_vm6, %v248_v55, %v246_v56  ;;  %1257 = vmatpush1.msk.msra.mxu0 %vm388_vm0, %v331_v48 }
  0x9e   : > { %v265_v60 = vmul.f32 %v258_v50, %v251_v58  ;;  %v266_v61 = vmul.f32 %v262_v51, %v250_v57  ;;  %1238 = vmatmul.mubr.msk.f32.vlgmr.msra.gmra.mrb[0].mxu1 %vm384_vm1, %v1235_v53  ;;  %1258 = vmatmul.mubr.msk.f32.vlgmr.msra.gmra.mrb[0].mxu0 %vm384_vm1, %v1255_v54 }
  0x9f   : > { %627 = vmatprep.mubr.f32.mxu1 %v1407_v0  ;;  %1045 = vmatprep.mubr.f32.mxu0 %v1407_v0 }
  0xa0   : > { %v336_v1 = vpop.permute.xlu1 %335  ;;  %1240 = vmatprep.subr.msk.mxu1 %vm388_vm0, %v266_v61  ;;  %v334_v2 = vpop.permute.xlu0 %333 }
  0xa1   : > { %v338_v3 = vsel %vm337_vm7, %v334_v2, %v336_v1  ;;  %v339_v4 = vsel %vm337_vm7, %v336_v1, %v334_v2  ;;  %1241 = vmatpush1.msk.msra.mxu1 %vm388_vm0, %v265_v60 }
  0xa2   : > { %v353_v5 = vmul.f32 %v346_v59, %v338_v3  ;;  %v354_v6 = vmul.f32 %v350_v62, %v339_v4 }
  0xa4   : > { %v270_v15 = vpop.permute.xlu1 %269  ;;  %v268_v16 = vpop.permute.xlu0 %267  ;;  %1260 = vmatprep.subr.msk.mxu0 %vm388_vm0, %v354_v6 }
  0xa5   : > { %v272_v17 = vsel %vm271_vm8, %v268_v16, %v270_v15  ;;  %v273_v18 = vsel %vm271_vm8, %v270_v15, %v268_v16  ;;  %1261 = vmatpush1.msk.msra.mxu0 %vm388_vm0, %v353_v5 }
  0xa6   : > { %v287_v20 = vmul.f32 %v280_v7, %v273_v18  ;;  %v288_v21 = vmul.f32 %v284_v11, %v272_v17  ;;  %1242 = vmatmul.mubr.msk.f32.vlgmr.msra.gmra.mrb[0].mxu1 %vm384_vm1, %v1239_v13  ;;  %1262 = vmatmul.mubr.msk.f32.vlgmr.msra.gmra.mrb[0].mxu0 %vm384_vm1, %v1259_v14 }
  0xa7   : > { %711 = vmatprep.mubr.f32.mxu1 %v1407_v0  ;;  %1129 = vmatprep.mubr.f32.mxu0 %v1407_v0 }
  0xa8   : > { %v358_v23 = vpop.permute.xlu1 %357  ;;  %1244 = vmatprep.subr.msk.mxu1 %vm388_vm0, %v288_v21  ;;  %v356_v24 = vpop.permute.xlu0 %355 }
  0xa9   : > { %v360_v9 = vsel %vm359_vm9, %v356_v24, %v358_v23  ;;  %v361_v25 = vsel %vm359_vm9, %v358_v23, %v356_v24  ;;  %1245 = vmatpush1.msk.msra.mxu1 %vm388_vm0, %v287_v20 }
  0xaa   : > { %v375_v26 = vmul.f32 %v368_v19, %v360_v9  ;;  %v376_v27 = vmul.f32 %v372_v22, %v361_v25 }
  0xac   : > { %1264 = vmatprep.subr.msk.mxu0 %vm388_vm0, %v376_v27 }
  0xad   : > { %1265 = vmatpush1.msk.msra.mxu0 %vm388_vm0, %v375_v26 }
  0xae   : > { %1246 = vmatmul.mubr.msk.f32.vlgmr.msra.gmra.mrb[0].mxu1 %vm384_vm1, %v1243_v8  ;;  %1266 = vmatmul.mubr.msk.f32.vlgmr.msra.gmra.mrb[0].mxu0 %vm384_vm1, %v1263_v10 }
  0xb9   : > { %v381_v0 = vpop.permute.xlu0 %380 }
 0x181   : > { %v713_v28 = vpop.f32.mrb[0].mxu1  ;;  %v1131_v29 = vpop.f32.mrb[0].mxu0 }
 0x182   : > { %v1274_v30 = vadd.f32 %v713_v28, %v381_v0  ;;  %v715_v31 = vpop.f32.mrb[1].mxu1  ;;  %v1133_v32 = vpop.f32.mrb[1].mxu0 }
 0x183   : > { %v1276_v33 = vadd.f32 %v715_v31, %v381_v0 }
 0x184   : > { %v1275_v34 = vadd.f32 %v1274_v30, %v1131_v29 }
 0x185   : > { %v1277_v35 = vadd.f32 %v1276_v33, %v1133_v32 }
 0x186   : > { %v1138_v36 = vmul.f32 0.2, %v1275_v34 }
 0x187   : > { %v1139_v37 = vmul.f32 0.2, %v1277_v35 }
 0x188   : > { %v1140_v38 = vmax.f32 %v1275_v34, %v1138_v36 }
 0x189   : > { %v1141_v39 = vmax.f32 %v1277_v35, %v1139_v37 }
 0x18a   : > { %1142 = vst [vmem:[%s190_s28] sm:$0xff] %v1140_v38 }
 0x18b   : > { %1143 = vst [vmem:[%s190_s28 + $0x8] sm:$0xff] %v1141_v39 }
 0x18c   : > { %1356 = shalt.err (!%p1353_p3)
}
 0x18d   : > { %s1357_s11 = scalar_lea.hbm %s1625_s6, 256  ;;  %s1361_s14 = scalar_lea.hbm %s1671_s4, 512 }
 0x18e   : > { %p1358_p4 = scmp.ne.s32.totalorder %s1625_s6, %s1357_s11  ;;  %p1362_p9 = scmp.lt.u32.totalorder %s1625_s6, %s1671_s4 }
 0x18f   : > { %p1363_p10 = scmp.lt.u32.totalorder %s1361_s14, %s1357_s11  ;;  %p1365_p12 = scmp.lt.u32.totalorder %s1357_s11, %s1625_s6 }
 0x190   : > { %p1359_p7 = pnand %p1358_p4, %p1481_p5 }
 0x191   : > { %p1364_p11 = por %p1363_p10, %p1362_p9 }
 0x192   : > { %p1360_p8 = pneg %p1359_p7 }
 0x193   : > { %p1366_p13 = por %p1365_p12, %p1364_p11 }
 0x195   : > { %p1367_p0 = pnand %p1366_p13, %p1360_p8 }
 0x197   : > { %1370 = shalt.err (!%p1367_p0)
}
 0x198   : > { %1292 = dma.vmem_to_hbm [thread:$0]  (%p1481_p5), %s1627_s29, 256, %s1625_s6, %s1145_s7  }
 0x199 PF: > { %p1298_p1 = scmp.ge.s32.totalorder %s1405_s18, 2  ;;  %s1171_s23 = sand.u32 1, %s1393_s15  }
 0x19a   : > { %s1172_s27 = scalar_lea.sflag [#allocation3], %s1171_s23 }
 0x19b   : > { %p1295_p2 = pnand %p1298_p1, %p1485_p6 }
 0x19d   : > { %1388 = dma.done.wait (!%p1295_p2), %s1172_s27, 256  }
 0x19e   : > { %1390 = vsyncadd (!%p1295_p2), %s1172_s27, 4294967040  ;;  %p14_p3 = scmp.ge.s32.totalorder %s1468_s21, 4   ;;  %s1674_s15 = smov %s1397_s16 }
 0x19f   : > { %s1675_s16 = smov %s1401_s17  ;;  %s1676_s17 = smov %s1479_s24 }
 0x1a0   : > { %s1677_s18 = smov %s1468_s21  ;;  %16 = sbr.rel (!%p14_p3) target bundleno = 3 (0x3), region = 86 }
 0x1a7   :  { %1177 = vsyncpa [#allocation3], 1 }
 0x1a8   :  { %1179 = vsyncpa [#allocation3 + $0x1], 1 }

</bundles_post_ra>
